<compile_context>
chip_gen: v6e
topology: v6e:2x2x1
jax: 0.10.0
libtpu: 0.0.40
codegen_flags: <defaults>
</compile_context>

<pallas_src>
import functools
import math

import jax
import jax.numpy as jnp
from jax import lax
from jax.experimental import pallas as pl
from jax.experimental.pallas import tpu as pltpu

# Large finite negative instead of -inf: avoids NaN on fully-masked rows (review note);
# exp(s - s_max) still underflows to exactly 0.0 for masked entries.
_MASK_NEG = -1e30


def _mha_kernel(bias_ref, xt_ref, wq_ref, bq_ref, wkv_ref, bkv_ref,
                wout_ref, bout_ref, out_ref, *, num_heads, head_dim, q_tile):
    """One (batch, q-tile) grid step.

    Layouts (feature dim on sublanes, sequence on lanes):
      bias_ref : (Hm, TQ, S)  f32   additive mask bias, Hm in {1, H}
      xt_ref   : (D_in, S)    bf16  transposed input for this batch element
      wq_ref   : (D,  D_in)   bf16  Q weight, (out, in)-oriented, 1/sqrt(hd) folded in
      bq_ref   : (D,  1)      f32   (scale folded in)
      wkv_ref  : (2D, D_in)   bf16  [K; V] weights, (out, in)-oriented
      bkv_ref  : (2D, 1)      f32
      wout_ref : (D,  D)      bf16  output projection, (in, out)-oriented
      bout_ref : (1,  D)      f32
      out_ref  : (TQ, D)      f32
    """
    H, hd = num_heads, head_dim
    D = H * hd

    x_all = xt_ref[...]                                          # (D_in, S) bf16
    if q_tile == x_all.shape[1]:                                  # single q tile -> no slice
        x_q = x_all
    else:
        q_start = pl.multiple_of(pl.program_id(1) * q_tile, q_tile)
        x_q = xt_ref[:, pl.ds(q_start, q_tile)]                   # (D_in, TQ) bf16

    # Projections: bf16 x bf16 -> f32 accumulation.  Attention scale already folded in.
    q_t = jnp.dot(wq_ref[...], x_q, preferred_element_type=jnp.float32) + bq_ref[...]
    kv_t = jnp.dot(wkv_ref[...], x_all, preferred_element_type=jnp.float32) + bkv_ref[...]
    S = kv_t.shape[1]

    # Head-major split along the (sublane) feature axis — layout-preserving reshapes only.
    q_h = q_t.reshape(H, hd, q_tile).astype(jnp.bfloat16)         # (H, hd, TQ)
    k_h = kv_t[:D].reshape(H, hd, S).astype(jnp.bfloat16)         # (H, hd, S)
    v_h = kv_t[D:].reshape(H, hd, S).astype(jnp.bfloat16)         # (H, hd, S)

    # Scores, batched over heads: s[h, i, j] = <q_i, k_j>_h   (scale folded into W_q).
    s = lax.dot_general(q_h, k_h, (((1,), (1,)), ((0,), (0,))),
                        preferred_element_type=jnp.float32)       # (H, TQ, S) f32
    s = s + bias_ref[...]                                         # additive mask; Hm broadcasts

    # Softmax in f32, normalization deferred past the P@V matmul.
    s_max = jnp.max(s, axis=-1, keepdims=True)
    p = jnp.exp(s - s_max)                                        # (H, TQ, S) f32
    l = jnp.sum(p, axis=-1)                                       # (H, TQ)

    # Unnormalized attention output (transposed): o_t[h, d, i] = sum_j v[h, d, j] p[h, i, j]
    o_t = lax.dot_general(v_h, p.astype(jnp.bfloat16),
                          (((2,), (2,)), ((0,), (0,))),
                          preferred_element_type=jnp.float32)     # (H, hd, TQ) f32
    o_t = o_t * pl.reciprocal(l, approx=True)[:, None, :]         # deferred denom (EUP slot)

    # Output projection: contract the concatenated-head axis; lane-dense (TQ, D) result.
    o2 = o_t.reshape(D, q_tile).astype(jnp.bfloat16)              # (D, TQ)
    out = lax.dot_general(o2, wout_ref[...], (((0,), (0,)), ((), ())),
                          preferred_element_type=jnp.float32)     # (TQ, D)
    out_ref[...] = (out + bout_ref[...]).astype(out_ref.dtype)


def multi_head_attention(x, params, mask=None, *, num_heads, q_tile=None):
    """x: (B, S, D_in); params = (wqkv (D_in, 3*D_out), bqkv (3*D_out,),
    wout (D_out, D_out) stored (in, out), bout (D_out,)); mask: bool, broadcastable to
    (B, num_heads, S, S) (True = keep), or None."""
    wqkv, bqkv, wout, bout = params
    B, S, D_in = x.shape
    D = wout.shape[0]
    assert D % num_heads == 0
    hd = D // num_heads
    scale = 1.0 / math.sqrt(hd)

    # ---- parameter re-layout (wrapper-side, one time) ---------------------------------
    wq_t = (wqkv[:, :D] * scale).T.astype(jnp.bfloat16)            # (D, D_in), scale folded
    bq_c = (bqkv[:D] * scale).reshape(D, 1).astype(jnp.float32)    # (D, 1),    scale folded
    wkv_t = wqkv[:, D:].T.astype(jnp.bfloat16)                     # (2D, D_in)
    bkv_c = bqkv[D:].reshape(2 * D, 1).astype(jnp.float32)         # (2D, 1)
    wout_c = wout.astype(jnp.bfloat16)                             # (D, D), (in, out)
    bout_c = bout.reshape(1, D).astype(jnp.float32)                # (1, D)

    # Transposed activations: feature dim on sublanes, sequence on lanes.
    xt = jnp.swapaxes(x, 1, 2).astype(jnp.bfloat16)                # (B, D_in, S)

    # ---- compact additive mask bias (no (B, H, S, S) f32 materialization) --------------
    if mask is None:
        bias = jnp.zeros((1, 1, S, S), jnp.float32)
    else:
        m = jnp.asarray(mask).astype(bool)
        m = m.reshape((1,) * (4 - m.ndim) + m.shape)
        m = jnp.broadcast_to(m, m.shape[:2] + (S, S))
        bias = jnp.where(m, 0.0, _MASK_NEG).astype(jnp.float32)    # (Bm, Hm, S, S)
    Bm, Hm = int(bias.shape[0]), int(bias.shape[1])
    assert Bm in (1, B) and Hm in (1, num_heads)

    # ---- grid: (batch, query tiles), both parallel --------------------------------------
    if q_tile is None:
        q_tile = 128 if (S > 128 and S % 128 == 0) else S
    assert S % q_tile == 0
    n_q = S // q_tile

    bias_idx = (lambda b, qi: (b, 0, qi, 0)) if Bm == B else (lambda b, qi: (0, 0, qi, 0))

    kernel = functools.partial(_mha_kernel, num_heads=num_heads, head_dim=hd, q_tile=q_tile)

    grid_spec = pltpu.PrefetchScalarGridSpec(
        num_scalar_prefetch=0,
        grid=(B, n_q),
        in_specs=[
            pl.BlockSpec((None, Hm, q_tile, S), bias_idx),             # mask bias (compact)
            pl.BlockSpec((None, D_in, S), lambda b, qi: (b, 0, 0)),    # x^T
            pl.BlockSpec((D, D_in), lambda b, qi: (0, 0)),             # W_q (scaled)
            pl.BlockSpec((D, 1), lambda b, qi: (0, 0)),                # b_q (scaled)
            pl.BlockSpec((2 * D, D_in), lambda b, qi: (0, 0)),         # W_kv
            pl.BlockSpec((2 * D, 1), lambda b, qi: (0, 0)),            # b_kv
            pl.BlockSpec((D, D), lambda b, qi: (0, 0)),                # W_out
            pl.BlockSpec((1, D), lambda b, qi: (0, 0)),                # b_out
        ],
        out_specs=pl.BlockSpec((None, q_tile, D), lambda b, qi: (b, qi, 0)),
    )

    return pl.pallas_call(
        kernel,
        grid_spec=grid_spec,
        out_shape=jax.ShapeDtypeStruct((B, S, D), jnp.float32),
        compiler_params=pltpu.CompilerParams(
            dimension_semantics=("parallel", "parallel"),
            vmem_limit_bytes=48 * 1024 * 1024,
        ),
    )(bias, xt, wq_t, bq_c, wkv_t, bkv_c, wout_c, bout_c)


def _reference(x, params, mask, num_heads):
    """Pure-JAX f32 replica of the PyTorch forward for validation."""
    wqkv, bqkv, wout, bout = params
    B, S, _ = x.shape
    D = wout.shape[0]
    hd = D // num_heads
    qkv = x @ wqkv + bqkv
    q, k, v = jnp.split(qkv, 3, axis=-1)

    def heads(t):  # (B, S, D) -> (B, H, S, hd)
        return t.reshape(B, S, num_heads, hd).transpose(0, 2, 1, 3)

    q, k, v = heads(q), heads(k), heads(v)
    s = jnp.einsum("bhqd,bhkd->bhqk", q, k) / math.sqrt(hd)
    if mask is not None:
        s = jnp.where(jnp.broadcast_to(mask, s.shape), s, -jnp.inf)
    p = jax.nn.softmax(s, axis=-1)
    o = jnp.einsum("bhqk,bhkd->bhqd", p, v)
    o = o.transpose(0, 2, 1, 3).reshape(B, S, D)
    return o @ wout + bout


if __name__ == "__main__":
    B, S = 2, 8
    input_dim, output_dim, num_heads = 32, 32, 4

    key = jax.random.PRNGKey(0)
    kx, kw1, kb1, kw2, kb2 = jax.random.split(key, 5)

    x = jax.random.normal(kx, (B, S, input_dim), jnp.float32)

    # Deterministic "nn.Linear"-style params (stored (in, out) so semantics are x @ W + b).
    lim1 = 1.0 / math.sqrt(input_dim)
    wqkv = jax.random.uniform(kw1, (input_dim, 3 * output_dim), jnp.float32, -lim1, lim1)
    bqkv = jax.random.uniform(kb1, (3 * output_dim,), jnp.float32, -lim1, lim1)
    lim2 = 1.0 / math.sqrt(output_dim)
    wout = jax.random.uniform(kw2, (output_dim, output_dim), jnp.float32, -lim2, lim2)
    bout = jax.random.uniform(kb2, (output_dim,), jnp.float32, -lim2, lim2)
    params = (wqkv, bqkv, wout, bout)

    # Causal mask (True = keep), kept compact at (1, 1, S, S).
    mask = jnp.tril(jnp.ones((S, S), bool))[None, None, :, :]

    # Masked case
    out = jax.block_until_ready(multi_head_attention(x, params, mask, num_heads=num_heads))
    ref = _reference(x, params, mask, num_heads)
    assert out.shape == (B, S, output_dim)
    err = float(jnp.max(jnp.abs(out - ref)))
    assert err < 5e-2, f"masked: max abs err {err} vs f32 reference (bf16 matmuls)"

    # Unmasked case
    out_nm = jax.block_until_ready(multi_head_attention(x, params, None, num_heads=num_heads))
    ref_nm = _reference(x, params, None, num_heads)
    err_nm = float(jnp.max(jnp.abs(out_nm - ref_nm)))
    assert err_nm < 5e-2, f"unmasked: max abs err {err_nm} vs f32 reference (bf16 matmuls)"

    print("KERNEL_OK")
</pallas_src>

<mosaic_0001>
module attributes {stable_mosaic.version = 11 : i64} {
  func.func @_mha_kernel(%arg0: i32, %arg1: i32, %arg2: memref<1x1x8x8xf32, #tpu.memory_space<vmem>>, %arg3: memref<1x32x8xbf16, #tpu.memory_space<vmem>>, %arg4: memref<32x32xbf16, #tpu.memory_space<vmem>>, %arg5: memref<32x1xf32, #tpu.memory_space<vmem>>, %arg6: memref<64x32xbf16, #tpu.memory_space<vmem>>, %arg7: memref<64x1xf32, #tpu.memory_space<vmem>>, %arg8: memref<32x32xbf16, #tpu.memory_space<vmem>>, %arg9: memref<1x32xf32, #tpu.memory_space<vmem>>, %arg10: memref<1x8x32xf32, #tpu.memory_space<vmem>>) attributes {dimension_semantics = [#tpu.dimension_semantics<parallel>, #tpu.dimension_semantics<parallel>], iteration_bounds = array<i64: 2, 1>, scalar_prefetch = 0 : i64, scratch_operands = 0 : i64, tpu.core_type = #tpu.core_type<tc>, window_params = [{transform_indices = @transform_0, window_bounds = array<i64: 1, 1, 8, 8>}, {transform_indices = @transform_1, window_bounds = array<i64: 1, 32, 8>}, {pipeline_mode = #tpu.pipeline_mode<synchronous>, transform_indices = @transform_2, window_bounds = array<i64: 32, 32>}, {pipeline_mode = #tpu.pipeline_mode<synchronous>, transform_indices = @transform_3, window_bounds = array<i64: 32, 1>}, {pipeline_mode = #tpu.pipeline_mode<synchronous>, transform_indices = @transform_4, window_bounds = array<i64: 64, 32>}, {pipeline_mode = #tpu.pipeline_mode<synchronous>, transform_indices = @transform_5, window_bounds = array<i64: 64, 1>}, {pipeline_mode = #tpu.pipeline_mode<synchronous>, transform_indices = @transform_6, window_bounds = array<i64: 32, 32>}, {pipeline_mode = #tpu.pipeline_mode<synchronous>, transform_indices = @transform_7, window_bounds = array<i64: 1, 32>}, {transform_indices = @transform_8, window_bounds = array<i64: 1, 8, 32>}]} {
    %c0 = arith.constant 0 : index
    %c0_0 = arith.constant 0 : index
    %c0_1 = arith.constant 0 : index
    %0 = vector.load %arg3[%c0, %c0_0, %c0_1] : memref<1x32x8xbf16, #tpu.memory_space<vmem>>, vector<1x32x8xbf16>
    %1 = vector.shape_cast %0 : vector<1x32x8xbf16> to vector<32x8xbf16>
    %c0_2 = arith.constant 0 : index
    %c0_3 = arith.constant 0 : index
    %2 = vector.load %arg4[%c0_2, %c0_3] : memref<32x32xbf16, #tpu.memory_space<vmem>>, vector<32x32xbf16>
    %cst = arith.constant dense<0.000000e+00> : vector<32x8xf32>
    %3 = tpu.matmul %2, %1, %cst {dimension_numbers = #tpu.dot_dimension_numbers<[1], [0], [0], [1], [0, 0, 1, 1], [], []>} : vector<32x32xbf16>, vector<32x8xbf16>, vector<32x8xf32> -> vector<32x8xf32>
    %c0_4 = arith.constant 0 : index
    %c0_5 = arith.constant 0 : index
    %4 = vector.load %arg5[%c0_4, %c0_5] : memref<32x1xf32, #tpu.memory_space<vmem>>, vector<32x1xf32>
    %5 = vector.broadcast %4 : vector<32x1xf32> to vector<32x8xf32>
    %6 = arith.addf %3, %5 : vector<32x8xf32>
    %c0_6 = arith.constant 0 : index
    %c0_7 = arith.constant 0 : index
    %7 = vector.load %arg6[%c0_6, %c0_7] : memref<64x32xbf16, #tpu.memory_space<vmem>>, vector<64x32xbf16>
    %cst_8 = arith.constant dense<0.000000e+00> : vector<64x8xf32>
    %8 = tpu.matmul %7, %1, %cst_8 {dimension_numbers = #tpu.dot_dimension_numbers<[1], [0], [0], [1], [0, 0, 1, 1], [], []>} : vector<64x32xbf16>, vector<32x8xbf16>, vector<64x8xf32> -> vector<64x8xf32>
    %c0_9 = arith.constant 0 : index
    %c0_10 = arith.constant 0 : index
    %9 = vector.load %arg7[%c0_9, %c0_10] : memref<64x1xf32, #tpu.memory_space<vmem>>, vector<64x1xf32>
    %10 = vector.broadcast %9 : vector<64x1xf32> to vector<64x8xf32>
    %11 = arith.addf %8, %10 : vector<64x8xf32>
    %12 = vector.shape_cast %6 : vector<32x8xf32> to vector<4x8x8xf32>
    %13 = arith.truncf %12 : vector<4x8x8xf32> to vector<4x8x8xbf16>
    %14 = vector.extract_strided_slice %11 {offsets = [0, 0], sizes = [32, 8], strides = [1, 1]} : vector<64x8xf32> to vector<32x8xf32>
    %15 = vector.shape_cast %14 : vector<32x8xf32> to vector<4x8x8xf32>
    %16 = arith.truncf %15 : vector<4x8x8xf32> to vector<4x8x8xbf16>
    %17 = vector.extract_strided_slice %11 {offsets = [32, 0], sizes = [32, 8], strides = [1, 1]} : vector<64x8xf32> to vector<32x8xf32>
    %18 = vector.shape_cast %17 : vector<32x8xf32> to vector<4x8x8xf32>
    %19 = arith.truncf %18 : vector<4x8x8xf32> to vector<4x8x8xbf16>
    %cst_11 = arith.constant dense<0.000000e+00> : vector<4x8x8xf32>
    %20 = tpu.matmul %13, %16, %cst_11 {dimension_numbers = #tpu.dot_dimension_numbers<[1], [1], [2], [2], [0, 0, 0, 2, 1, 2], [0], [0]>} : vector<4x8x8xbf16>, vector<4x8x8xbf16>, vector<4x8x8xf32> -> vector<4x8x8xf32>
    %c0_12 = arith.constant 0 : index
    %c0_13 = arith.constant 0 : index
    %c0_14 = arith.constant 0 : index
    %c0_15 = arith.constant 0 : index
    %21 = vector.load %arg2[%c0_12, %c0_13, %c0_14, %c0_15] : memref<1x1x8x8xf32, #tpu.memory_space<vmem>>, vector<1x1x8x8xf32>
    %22 = vector.shape_cast %21 : vector<1x1x8x8xf32> to vector<1x8x8xf32>
    %23 = vector.broadcast %22 : vector<1x8x8xf32> to vector<4x8x8xf32>
    %24 = arith.addf %20, %23 : vector<4x8x8xf32>
    %cst_16 = arith.constant dense<0xFF800000> : vector<4x8xf32>
    %25 = vector.multi_reduction <maximumf>, %24, %cst_16 [2] : vector<4x8x8xf32> to vector<4x8xf32>
    %26 = vector.shape_cast %25 : vector<4x8xf32> to vector<4x8x1xf32>
    %27 = vector.broadcast %26 : vector<4x8x1xf32> to vector<4x8x8xf32>
    %28 = arith.subf %24, %27 : vector<4x8x8xf32>
    %29 = math.exp %28 : vector<4x8x8xf32>
    %cst_17 = arith.constant dense<0.000000e+00> : vector<4x8xf32>
    %30 = vector.multi_reduction <add>, %29, %cst_17 [2] : vector<4x8x8xf32> to vector<4x8xf32>
    %31 = arith.truncf %29 : vector<4x8x8xf32> to vector<4x8x8xbf16>
    %cst_18 = arith.constant dense<0.000000e+00> : vector<4x8x8xf32>
    %32 = tpu.matmul %19, %31, %cst_18 {dimension_numbers = #tpu.dot_dimension_numbers<[2], [2], [1], [1], [0, 0, 0, 1, 1, 1], [0], [0]>} : vector<4x8x8xbf16>, vector<4x8x8xbf16>, vector<4x8x8xf32> -> vector<4x8x8xf32>
    %33 = tpu.reciprocal %30 {approx = true} : vector<4x8xf32> -> vector<4x8xf32>
    %34 = vector.shape_cast %33 : vector<4x8xf32> to vector<4x1x8xf32>
    %35 = vector.broadcast %34 : vector<4x1x8xf32> to vector<4x8x8xf32>
    %36 = arith.mulf %32, %35 : vector<4x8x8xf32>
    %37 = vector.shape_cast %36 : vector<4x8x8xf32> to vector<32x8xf32>
    %38 = arith.truncf %37 : vector<32x8xf32> to vector<32x8xbf16>
    %c0_19 = arith.constant 0 : index
    %c0_20 = arith.constant 0 : index
    %39 = vector.load %arg8[%c0_19, %c0_20] : memref<32x32xbf16, #tpu.memory_space<vmem>>, vector<32x32xbf16>
    %cst_21 = arith.constant dense<0.000000e+00> : vector<8x32xf32>
    %40 = tpu.matmul %38, %39, %cst_21 {dimension_numbers = #tpu.dot_dimension_numbers<[0], [0], [1], [1], [0, 1, 1, 1], [], []>} : vector<32x8xbf16>, vector<32x32xbf16>, vector<8x32xf32> -> vector<8x32xf32>
    %c0_22 = arith.constant 0 : index
    %c0_23 = arith.constant 0 : index
    %41 = vector.load %arg9[%c0_22, %c0_23] : memref<1x32xf32, #tpu.memory_space<vmem>>, vector<1x32xf32>
    %42 = vector.broadcast %41 : vector<1x32xf32> to vector<8x32xf32>
    %43 = arith.addf %40, %42 : vector<8x32xf32>
    %c0_24 = arith.constant 0 : index
    %c0_25 = arith.constant 0 : index
    %c0_26 = arith.constant 0 : index
    %44 = vector.load %arg10[%c0_24, %c0_25, %c0_26] : memref<1x8x32xf32, #tpu.memory_space<vmem>>, vector<1x8x32xf32>
    %45 = vector.shape_cast %44 : vector<1x8x32xf32> to vector<8x32xf32>
    %46 = vector.shape_cast %43 : vector<8x32xf32> to vector<1x8x32xf32>
    tpu.vector_store %arg10[%c0_24, %c0_25, %c0_26], %46 {strides = array<i32>} : memref<1x8x32xf32, #tpu.memory_space<vmem>>, vector<1x8x32xf32>,
    return
  }
  func.func @transform_0(%arg0: i32, %arg1: i32) -> (i32, i32, i32, i32) {
    %c0_i32 = arith.constant 0 : i32
    %c0_i32_0 = arith.constant 0 : i32
    %c0_i32_1 = arith.constant 0 : i32
    %c0_i32_2 = arith.constant 0 : i32
    return %c0_i32, %c0_i32_0, %arg1, %c0_i32_1 : i32, i32, i32, i32
  }
  func.func @transform_1(%arg0: i32, %arg1: i32) -> (i32, i32, i32) {
    %c0_i32 = arith.constant 0 : i32
    %c0_i32_0 = arith.constant 0 : i32
    %c0_i32_1 = arith.constant 0 : i32
    return %arg0, %c0_i32, %c0_i32_0 : i32, i32, i32
  }
  func.func @transform_2(%arg0: i32, %arg1: i32) -> (i32, i32) {
    %c0_i32 = arith.constant 0 : i32
    %c0_i32_0 = arith.constant 0 : i32
    %c0_i32_1 = arith.constant 0 : i32
    return %c0_i32, %c0_i32_0 : i32, i32
  }
  func.func @transform_3(%arg0: i32, %arg1: i32) -> (i32, i32) {
    %c0_i32 = arith.constant 0 : i32
    %c0_i32_0 = arith.constant 0 : i32
    %c0_i32_1 = arith.constant 0 : i32
    return %c0_i32, %c0_i32_0 : i32, i32
  }
  func.func @transform_4(%arg0: i32, %arg1: i32) -> (i32, i32) {
    %c0_i32 = arith.constant 0 : i32
    %c0_i32_0 = arith.constant 0 : i32
    %c0_i32_1 = arith.constant 0 : i32
    return %c0_i32, %c0_i32_0 : i32, i32
  }
  func.func @transform_5(%arg0: i32, %arg1: i32) -> (i32, i32) {
    %c0_i32 = arith.constant 0 : i32
    %c0_i32_0 = arith.constant 0 : i32
    %c0_i32_1 = arith.constant 0 : i32
    return %c0_i32, %c0_i32_0 : i32, i32
  }
  func.func @transform_6(%arg0: i32, %arg1: i32) -> (i32, i32) {
    %c0_i32 = arith.constant 0 : i32
    %c0_i32_0 = arith.constant 0 : i32
    %c0_i32_1 = arith.constant 0 : i32
    return %c0_i32, %c0_i32_0 : i32, i32
  }
  func.func @transform_7(%arg0: i32, %arg1: i32) -> (i32, i32) {
    %c0_i32 = arith.constant 0 : i32
    %c0_i32_0 = arith.constant 0 : i32
    %c0_i32_1 = arith.constant 0 : i32
    return %c0_i32, %c0_i32_0 : i32, i32
  }
  func.func @transform_8(%arg0: i32, %arg1: i32) -> (i32, i32, i32) {
    %c0_i32 = arith.constant 0 : i32
    %c0_i32_0 = arith.constant 0 : i32
    return %arg0, %arg1, %c0_i32 : i32, i32, i32
  }
}

</mosaic_0001>

<bundles_post_ra>
// kernel: tpu_custom_call.1
= control target key start
LH: loop header
LB: loop body
LE: loop exit
PB: predicated region body
PF: predicated region fallthrough
CT: control target
= control target key end

     0   :  { %13 = vsyncpa [#allocation3], 0  ;;  %s1940_s0 = inlined_call_operand.vmem [shape: f32[1,1,8,8], index: 0, kind: input, shape index: {}]   ;;  %s1941_s1 = inlined_call_operand.vmem [shape: bf16[2,32,8], index: 1, kind: input, shape index: {}]   ;;  %s1942_s2 = inlined_call_operand.vmem [shape: bf16[32,32], index: 2, kind: input, shape index: {}]   ;;  %s1943_s3 = inlined_call_operand.vmem [shape: f32[32,1], index: 3, kind: input, shape index: {}]   ;;  %s1944_s4 = inlined_call_operand.vmem [shape: bf16[64,32], index: 4, kind: input, shape index: {}]   ;;  %s1945_s5 = inlined_call_operand.vmem [shape: f32[64,1], index: 5, kind: input, shape index: {}]   ;;  %s1946_s6 = inlined_call_operand.vmem [shape: bf16[32,32], index: 6, kind: input, shape index: {}]   ;;  %s1947_s7 = inlined_call_operand.vmem [shape: f32[1,32], index: 7, kind: input, shape index: {}]   ;;  %s1948_s8 = inlined_call_operand.hbm [shape: f32[2,8,32], index: 8, kind: output, shape index: {}]  }
   0x1   :  { %15 = vsyncpa [#allocation3 + $0x1], 0  ;;  %s1691_s27 = smov 0   ;;  %s1693_s28 = smov 0  }
   0x2   :  { %s1695_s29 = smov 0   ;;  %s1697_s30 = smov 0  }
   0x3   :  { %s1699_s9 = smov 0   ;;  %s1701_s10 = smov 0  }
   0x4 LB: > { %s1333_s11 = sadd.s32 4294967295, %s1640_s10   ;;  %s1334_s12 = sadd.s32 4294967294, %s1640_s10   ;;  %s1640_s10 = sphi %s1701_s10, %s21_s10   ;;  %s1636_s9 = sphi %s1699_s9, %s1955_s9   ;;  %s1632_s30 = sphi %s1697_s30, %s1954_s30   ;;  %s1628_s29 = sphi %s1695_s29, %s1953_s29   ;;  %s1624_s28 = sphi %s1693_s28, %s1952_s28   ;;  %s1620_s27 = sphi %s1691_s27, %s1951_s27  }
   0x5   : > { %s33_s13 = sadd.s32 1, %s1636_s9  ;;  %s220_s14 = sadd.s32 1, %s1628_s29 }
   0x6   : > { %p35_p0 = scmp.ge.s32.totalorder %s33_s13, 2  ;;  %p230_p1 = scmp.ne.s32.totalorder %s1628_s29, %s1624_s28 }
   0x7   : > { %p231_p2 = scmp.eq.s32.totalorder %s1333_s11, 1  ;;  %p236_p3 = scmp.ne.s32.totalorder %s1624_s28, %s1620_s27 }
   0x8   : > { %s1957_s13 = smov (%p35_p0, %s33_s13), 0  ;;  %p237_p5 = scmp.eq.s32.totalorder %s1334_s12, 1 }
   0x9   : > { %p1731_p4 = por %p231_p2, %p230_p1  ;;  %s215_s16 = ssub.s32 %s1636_s9, %s1957_s13 }
   0xa   : > { %p1338_p6 = scmp.ge.s32.totalorder %s1640_s10, 1  ;;  %p218_p7 = scmp.eq.s32.totalorder %s215_s16, 0 }
   0xb   : > { %p1738_p8 = por %p237_p5, %p236_p3  ;;  %p288_p9 = scmp.lt.s32.totalorder %s1640_s10, 3 }
   0xc   : > { %s1744_s18 = scalar_select %p218_p7, %s1628_s29, %s220_s14  }
   0xd   : > { %p289_p10 = pnand %p1338_p6, %p288_p9 }
   0xe   : > { %p330_p11 = scmp.lt.s32.totalorder (!%p289_p10), %s1632_s30, 1  ;;  %s323_s16 = sand.u32 (!%p289_p10), 1, %s1624_s28  }
   0xf   : > { %292 = sbr.rel (%p289_p10) target bundleno = 1211 (0x4bb), region = 52  ;;  %s1369_s22 = sshll.u32 (!%p289_p10), %s1632_s30, 7 }
  0x10   : > { %s1893_s11 = scalar_lea.hbm (!%p289_p10), %s1948_s8, %s1369_s22  ;;  %s1236_s12 = scalar_lea.sflag (!%p289_p10), [#allocation3], %s323_s16 }
  0x11   : > { %s1645_s14 = smov (!%p289_p10), [#allocation2]  }
  0x14   : > { %v1540_v0 = vld [vmem:[%s1942_s2] sm:$0xff]   ;;  %vm390_vm0 = vcmask 261120   ;;  %s331_s23 = scalar_select %p330_p11, %s1632_s30, 1  ;;  %v1642_v2 = vmov 0   ;;  %v346_v4 = vld [vmem:[%s1943_s3 + $0x10] sm:$0xff]  ;;  %v345_v7 = vld [vmem:[%s1943_s3 + $0x8] sm:$0xff] }
  0x15   : > { %v1541_v1 = vld [vmem:[%s1944_s4] sm:$0xff]   ;;  %1406 = vmatprep.mubr.msk.bf16.mxu0 %vm390_vm0, %v1540_v0  ;;  %1536 = vset.pattern.permute.xlu0 %v1642_v2  ;;  %v347_v8 = vld [vmem:[%s1943_s3 + $0x18] sm:$0xff]  ;;  %v1542_v9 = vld [vmem:[%s1942_s2 + $0x8] sm:$0xff]   ;;  %v1643_v17 = vmov 0.0   ;;  %vm1644_vm1 = vmmov 0   ;;  %vm632_vm2 = vcmask 1043456  }
  0x16   : > { %1414 = vmatprep.mubr.msk.bf16.mxu1 %vm390_vm0, %v1541_v1  ;;  %s1372_s24 = sshll.u32 %s331_s23, 4  ;;  %v344_v3 = vld [vmem:[%s1943_s3] sm:$0xff]  ;;  %1537 = vset.pattern.permute.xlu1 %v1642_v2  ;;  %v1543_v10 = vld [vmem:[%s1944_s4 + $0x8] sm:$0xff]   ;;  %v1544_v13 = vld [vmem:[%s1944_s4 + $0x10] sm:$0xff]   ;;  %vm628_vm3 = vcmask 64512  }
  0x17   : > { %s334_s19 = scalar_lea.vmem %s1941_s1, %s1372_s24  ;;  %350 = vperm.xlu0 %1536, %v344_v3   ;;  %360 = vperm.xlu1 %1537, %v346_v4   ;;  %v454_v11 = vld [vmem:[%s1945_s5] sm:$0xff]  ;;  %v455_v12 = vld [vmem:[%s1945_s5 + $0x8] sm:$0xff]  ;;  %v456_v14 = vld [vmem:[%s1945_s5 + $0x10] sm:$0xff] }
  0x18   : > { %v1538_v5 = vld [vmem:[%s334_s19 + $0x8] sm:$0xff]   ;;  %v1539_v6 = vld [vmem:[%s334_s19] sm:$0xff]   ;;  %v457_v15 = vld [vmem:[%s1945_s5 + $0x18] sm:$0xff]  ;;  %s1339_s19 = sshll.u32 %s323_s16, 3 }
  0x19   : > { %1402 = vmatprep.subr.bf16.mxu0 %v1538_v5  ;;  %1410 = vmatprep.subr.bf16.mxu1 %v1538_v5  ;;  %v1545_v16 = vld [vmem:[%s1944_s4 + $0x18] sm:$0xff]   ;;  %v458_v43 = vld [vmem:[%s1945_s5 + $0x20] sm:$0xff]  ;;  %s325_s23 = scalar_lea.vmem [#allocation2], %s1339_s19  ;;  %s1568_s19 = sshll.u32 %s1645_s14, 4  ;;  %s1569_s19 = int_to_ptr.vmem [resolvable:$false] %s1568_s19 }
  0x1a   : > { %1403 = vmatpush3.bf16.msra.mxu0 %v1538_v5  ;;  %1411 = vmatpush3.bf16.msra.mxu1 %v1538_v5  ;;  %v611_v1 = vld [vmem:[%s1940_s0] sm:$0xff]  ;;  %s1250_s25 = sshll.u32 %s325_s23, 4  ;;  %s1570_s20 = scalar_lea.vmem %s1569_s19, 256  ;;  %s1895_s25 = int_to_ptr.vmem [resolvable:$true] %s1250_s25 }
  0x1b   : > { %1404 = vmatprep.subr.bf16.mxu0 %v1539_v6  ;;  %1412 = vmatprep.subr.bf16.mxu1 %v1539_v6  ;;  %s1564_s30 = scalar_lea.vmem %s1895_s25, 128  ;;  %p1571_p1 = scmp.lt.s32.totalorder %s1895_s25, %s1569_s19 }
  0x1c   : > { %355 = vperm.xlu0 %1536, %v345_v7   ;;  %365 = vperm.xlu1 %1537, %v347_v8   ;;  %p1565_p12 = scmp.ne.s32.totalorder %s1895_s25, %s1564_s30  ;;  %p1572_p2 = scmp.lt.s32.totalorder %s1570_s20, %s1564_s30 }
  0x1e   : > { %1405 = vmatpush3.bf16.msra.mxu0 %v1539_v6  ;;  %1413 = vmatpush3.bf16.msra.mxu1 %v1539_v6  ;;  %p1566_p13 = pnand %p1565_p12, %p1731_p4  ;;  %p1573_p3 = por %p1572_p2, %p1571_p1 }
  0x1f   : > { %1422 = vmatprep.subr.bf16.mxu0 %v1643_v17  ;;  %1434 = vmatprep.subr.bf16.mxu1 %v1643_v17 }
  0x20   : > { %464 = vperm.xlu0 %1536, %v454_v11   ;;  %469 = vperm.xlu1 %1537, %v455_v12   ;;  %p1567_p0 = pneg %p1566_p13 }
  0x21   : > { %1407 = vmatmul.mubr.msk.bf16.vlgmr.msra.gmra.mxu0 %vm390_vm0, %v1542_v9  ;;  %1415 = vmatmul.mubr.msk.bf16.vlgmr.msra.gmra.mxu1 %vm390_vm0, %v1543_v10 }
  0x22   : > { %1418 = vmatprep.mubr.msk.bf16.mxu1 %vm390_vm0, %v1544_v13  ;;  %1424 = vmatprep.mubr.msk.bf16.mxu0 %vm1644_vm1, %v1643_v17  ;;  %p1574_p5 = pnand %p1573_p3, %p1567_p0 }
  0x24   : > { %474 = vperm.xlu0 %1536, %v456_v14   ;;  %479 = vperm.xlu1 %1537, %v457_v15  }
  0x29   : > { %1419 = vmatmul.mubr.msk.bf16.gmra.mxu1 %vm390_vm0, %v1545_v16 }
  0x2a   : > { %1436 = vmatprep.mubr.msk.bf16.mxu1 %vm1644_vm1, %v1643_v17 }
  0x92   : > { %v351_v18 = vpop.permute.xlu0 %350  ;;  %v361_v24 = vpop.permute.xlu1 %360 }
  0x97   : > { %v356_v19 = vpop.permute.xlu0 %355  ;;  %v366_v39 = vpop.permute.xlu1 %365 }
  0x9b   : > { %v465_v20 = vpop.permute.xlu0 %464  ;;  %v470_v47 = vpop.permute.xlu1 %469 }
  0x9f   : > { %v475_v21 = vpop.permute.xlu0 %474  ;;  %v480_v50 = vpop.permute.xlu1 %479 }
  0xe1   : > { %v1408_v22 = vpop.f32.mrf.mxu0  ;;  %v1416_v23 = vpop.f32.mrf.mxu1 }
  0xe2   : > { %v577_v25 = vadd.f32 %v1416_v23, %v475_v21  ;;  %v440_v32 = vadd.f32 %v1408_v22, %v361_v24 }
  0xe3   : > { %v431_v26 = vpop.f32.mrf.mxu0  ;;  %v568_v27 = vpop.f32.mrf.mxu1 }
  0xe4   : > { %v605_v28 = vpack.c.bf16 %v577_v25, %v577_v25  ;;  %v432_v29 = vadd.f32 %v431_v26, %v351_v18  ;;  %v569_v30 = vadd.f32 %v568_v27, %v465_v20  ;;  %v601_v40 = vpack.c.bf16 %v440_v32, %v440_v32  ;;  %v460_v25 = vld [vmem:[%s1945_s5 + $0x30] sm:$0xff]  ;;  %v461_v26 = vld [vmem:[%s1945_s5 + $0x38] sm:$0xff]  ;;  %v459_v27 = vld [vmem:[%s1945_s5 + $0x28] sm:$0xff] }
  0xe5   : > { %v1409_v31 = vpop.f32.mrf.mxu0  ;;  %v1417_v45 = vpop.f32.mrf.mxu1 }
  0xe6   : > { %v758_v33 = vsel %vm632_vm2, %v605_v28, 0  ;;  %v599_v34 = vpack.c.bf16 %v432_v29, %v432_v29  ;;  %v603_v35 = vpack.c.bf16 %v569_v30, %v569_v30  ;;  %v443_v41 = vadd.f32 %v1409_v31, %v366_v39 }
  0xe7   : > { %v434_v36 = vpop.f32.mrf.mxu0  ;;  %1435 = vmatpush3.bf16.msra.mxu1 %v758_v33  ;;  %v571_v46 = vpop.f32.mrf.mxu1  ;;  %v580_v52 = vadd.f32 %v1417_v45, %v480_v50 }
  0xe8   : > { %v634_v37 = vsel %vm632_vm2, %v603_v35, 0  ;;  %v435_v38 = vadd.f32 %v434_v36, %v356_v19  ;;  %612 = vxpose.xlu0.c.b16.start.end [1/1] (short) (narrow) %v599_v34, 16  ;;  %1446 = vmatprep.subr.bf16.mxu1 %v1643_v17  ;;  %v602_v44 = vpack.c.bf16 %v443_v41, %v443_v41  ;;  %v572_v48 = vadd.f32 %v571_v46, %v470_v47 }
  0xe9   : > { %1423 = vmatpush3.bf16.msra.mxu0 %v634_v37  ;;  %v606_v55 = vpack.c.bf16 %v580_v52, %v580_v52  ;;  %v1828_v59 = vpop.f32.mrf.mxu1 }
  0xea   : > { %v600_v42 = vpack.c.bf16 %v435_v38, %v435_v38  ;;  %1428 = vmatprep.subr.bf16.mxu0 %v1643_v17  ;;  %v604_v49 = vpack.c.bf16 %v572_v48, %v572_v48 }
  0xeb   : > { %v820_v57 = vsel %vm632_vm2, %v606_v55, 0  ;;  %v1830_v60 = vpop.f32.mrf.mxu1 }
  0xec   : > { %676 = vxpose.xlu1.c.b16.start.end [1/1] (short) (narrow) %v600_v42, 16  ;;  %738 = vxpose.xlu0.c.b16.start.end [1/1] (short) (narrow) %v601_v40, 16  ;;  %v696_v53 = vsel %vm632_vm2, %v604_v49, 0 }
  0xed   : > { %v1832_v61 = vpop.f32.mrf.mxu1 }
  0xef   : > { %v1834_v63 = vpop.f32.mrf.mxu1 }
  0xf0   : > { %484 = vperm.xlu1 %1537, %v458_v43   ;;  %800 = vxpose.xlu0.c.b16.start.end [1/1] (short) (narrow) %v602_v44, 16 }
 0x14a   : > { %v620_v51 = vpop.trf.xlu0 }
 0x14b   : > { %1425 = vmatmul.mubr.msk.bf16.vlgmr.msra.gmra.mxu0 %vm628_vm3, %v620_v51 }
 0x14c   : > { %1429 = vmatpush3.bf16.msra.mxu0 %v696_v53  ;;  %1430 = vmatprep.mubr.msk.bf16.mxu0 %vm1644_vm1, %v1643_v17 }
 0x14d   : > { %1440 = vmatprep.subr.bf16.mxu0 %v1643_v17 }
 0x14e   : > { %v746_v54 = vpop.trf.xlu0  ;;  %v684_v56 = vpop.trf.xlu1 }
 0x14f   : > { %1437 = vmatmul.mubr.msk.bf16.vlgmr.msra.gmra.mxu1 %vm628_vm3, %v746_v54 }
 0x150   : > { %1448 = vmatprep.mubr.msk.bf16.mxu1 %vm1644_vm1, %v1643_v17 }
 0x152   : > { %v808_v58 = vpop.trf.xlu0 }
 0x153   : > { %1431 = vmatmul.mubr.msk.bf16.vlgmr.msra.gmra.mxu0 %vm628_vm3, %v684_v56 }
 0x154   : > { %1441 = vmatpush3.bf16.msra.mxu0 %v820_v57  ;;  %1442 = vmatprep.mubr.msk.bf16.mxu0 %vm1644_vm1, %v1643_v17 }
 0x155   : > { %1452 = vmatprep.subr.bf16.mxu0 %v1643_v17 }
 0x15b   : > { %1443 = vmatmul.mubr.msk.bf16.vlgmr.msra.gmra.mxu0 %vm628_vm3, %v808_v58 }
 0x15c   : > { %1454 = vmatprep.mubr.msk.bf16.mxu0 %vm1644_vm1, %v1643_v17 }
 0x16b   : > { %v485_v28 = vpop.permute.xlu1 %484 }
 0x16c   : > { %v585_v51 = vadd.f32 %v1830_v60, %v485_v28 }
 0x16e   : > { %v607_v57 = vpack.c.bf16 %v585_v51, %v585_v51 }
 0x20b   : > { %v670_v62 = vpop.f32.mrf.mxu0 }
 0x20c   : > { %v671_v7 = vadd.f32 %v670_v62, %v611_v1 }
 0x20d   : > { %v1426_v0 = vpop.f32.mrf.mxu0 }
 0x20e   : > { %v862_v15 = vsel %vm628_vm3, %v671_v7, -inf }
 0x20f   : > { %v673_v2 = vpop.f32.mrf.mxu0  ;;  %v794_v3 = vpop.f32.mrf.mxu1 }
 0x210   : > { %v795_v4 = vadd.f32 %v794_v3, %v611_v1 }
 0x211   : > { %v1427_v5 = vpop.f32.mrf.mxu0  ;;  %v1438_v6 = vpop.f32.mrf.mxu1 }
 0x212   : > { %v868_v8 = vsel %vm628_vm3, %v795_v4, -inf }
 0x213   : > { %v732_v9 = vpop.f32.mrf.mxu0  ;;  %869 = vmax.xlane.f32.xlu1 %v868_v8  ;;  %v797_v10 = vpop.f32.mrf.mxu1 }
 0x214   : > { %v733_v11 = vadd.f32 %v732_v9, %v611_v1  ;;  %v1094_v9 = vlaneseq }
 0x215   : > { %v1432_v12 = vpop.f32.mrf.mxu0  ;;  %v1439_v13 = vpop.f32.mrf.mxu1 }
 0x216   : > { %v865_v14 = vsel %vm628_vm3, %v733_v11, -inf  ;;  %v1097_v12 = vshrl.u32 %v1094_v9, 7 }
 0x217   : > { %866 = vmax.xlane.f32.xlu0 %v865_v14  ;;  %v735_v16 = vpop.f32.mrf.mxu0  ;;  %863 = vmax.xlane.f32.xlu1 %v862_v15 }
 0x219   : > { %v1433_v18 = vpop.f32.mrf.mxu0 }
 0x21b   : > { %v856_v19 = vpop.f32.mrf.mxu0 }
 0x21c   : > { %v857_v20 = vadd.f32 %v856_v19, %v611_v1 }
 0x21d   : > { %v1444_v21 = vpop.f32.mrf.mxu0 }
 0x21e   : > { %v871_v22 = vsel %vm628_vm3, %v857_v20, -inf }
 0x21f   : > { %872 = vmax.xlane.f32.xlu0 %v871_v22  ;;  %v859_v23 = vpop.f32.mrf.mxu0 }
 0x221   : > { %v1445_v24 = vpop.f32.mrf.mxu0 }
 0x228   : > { %494 = vperm.xlu1 %1537, %v460_v25  }
 0x22c   : > { %499 = vperm.xlu1 %1537, %v461_v26  }
 0x235   : > { %489 = vperm.xlu0 %1536, %v459_v27  }
 0x29c   : > { %v870_v29 = vpop.xlane.xlu1 %869 }
 0x29d   : > { %v876_v30 = vsub.f32 %v795_v4, %v870_v29 }
 0x29f   : > { %v882_v35 = vmul.f32 1.442695, %v876_v30 }
 0x2a0   : > { %v864_v31 = vpop.xlane.xlu1 %863  ;;  %v867_v32 = vpop.xlane.xlu0 %866 }
 0x2a1   : > { %v874_v33 = vsub.f32 %v671_v7, %v864_v31  ;;  %v875_v34 = vsub.f32 %v733_v11, %v867_v32  ;;  %v1095_v11 = vand.u32 127, %v1094_v9 }
 0x2a3   : > { %v878_v36 = vmul.f32 1.442695, %v874_v33  ;;  %v880_v37 = vmul.f32 1.442695, %v875_v34  ;;  %v1098_v13 = vsub.s32 %v1095_v11, %v1097_v12 }
 0x2a4   : > { %v495_v52 = vpop.permute.xlu1 %494 }
 0x2a5   : > { %1548 = vpow2.f32 %v878_v36 }
 0x2a6   : > { %1550 = vpow2.f32 %v880_v37 }
 0x2a7   : > { %1552 = vpow2.f32 %v882_v35 }
 0x2a8   : > { %v873_v38 = vpop.xlane.xlu0 %872  ;;  %v500_v60 = vpop.permute.xlu1 %499 }
 0x2a9   : > { %v877_v39 = vsub.f32 %v857_v20, %v873_v38  ;;  %v596_v3 = vadd.f32 %v1832_v61, %v500_v60  ;;  %v1547_v61 = vld [vmem:[%s1946_s6] sm:$0xff]  }
 0x2ab   : > { %v884_v40 = vmul.f32 1.442695, %v877_v39  ;;  %v610_v5 = vpack.c.bf16 %v596_v3, %v596_v3 }
 0x2ad   : > { %1554 = vpow2.f32 %v884_v40 }
 0x2b0   : > { %v490_v48 = vpop.permute.xlu0 %489 }
 0x2b1   : > { %v588_v54 = vadd.f32 %v1834_v63, %v490_v48  ;;  %v593_v63 = vadd.f32 %v1828_v59, %v495_v52  ;;  %v1546_v59 = vld [vmem:[%s1946_s6 + $0x8] sm:$0xff]  }
 0x2b2   : > { %v1549_v41 = vpop.eup %1548 }
 0x2b3   : > { %v1551_v42 = vpop.eup %1550  ;;  %v886_v43 = vsel %vm628_vm3, %v1549_v41, 0.0  ;;  %v898_v44 = vpack.c.bf16 %v1549_v41, %v1549_v41  ;;  %v608_v0 = vpack.c.bf16 %v588_v54, %v588_v54  ;;  %v609_v4 = vpack.c.bf16 %v593_v63, %v593_v63 }
 0x2b4   : > { %v1553_v45 = vpop.eup %1552  ;;  %887 = vadd.xlane.f32.xlu0 %v886_v43  ;;  %v889_v46 = vsel %vm628_vm3, %v1551_v42, 0.0  ;;  %v899_v47 = vpack.c.bf16 %v1551_v42, %v1551_v42 }
 0x2b5   : > { %890 = vadd.xlane.f32.xlu1 %v889_v46  ;;  %v906_v49 = vsel %vm628_vm3, %v898_v44, 0  ;;  %v892_v53 = vsel %vm628_vm3, %v1553_v45, 0.0  ;;  %v900_v55 = vpack.c.bf16 %v1553_v45, %v1553_v45  ;;  %v1364_v45 = vld [vmem:[%s1947_s7] ss:$0 sm:$0xff] }
 0x2b6   : > { %1447 = vmatpush3.bf16.xpose.msra.mxu1 %v906_v49  ;;  %v952_v50 = vsel %vm628_vm3, %v899_v47, 0 }
 0x2b7   : > { %1453 = vmatpush3.bf16.xpose.msra.mxu0 %v952_v50  ;;  %1458 = vmatprep.subr.bf16.mxu1 %v1643_v17  ;;  %v998_v1 = vsel %vm628_vm3, %v900_v55, 0 }
 0x2b8   : > { %893 = vadd.xlane.f32.xlu0 %v892_v53  ;;  %1464 = vmatprep.subr.bf16.mxu0 %v1643_v17 }
 0x2ba   : > { %v1555_v56 = vpop.eup %1554 }
 0x2bb   : > { %v895_v58 = vsel %vm628_vm3, %v1555_v56, 0.0  ;;  %v901_v62 = vpack.c.bf16 %v1555_v56, %v1555_v56 }
 0x2bc   : > { %896 = vadd.xlane.f32.xlu0 %v895_v58 }
 0x2bd   : > { %1449 = vmatmul.mubr.msk.bf16.vlgmr.msra.gmra.mxu1 %vm628_vm3, %v607_v57  ;;  %v1044_v2 = vsel %vm628_vm3, %v901_v62, 0 }
 0x2be   : > { %1455 = vmatmul.mubr.msk.bf16.vlgmr.msra.gmra.mxu0 %vm628_vm3, %v608_v0  ;;  %1459 = vmatpush3.bf16.xpose.msra.mxu1 %v998_v1 }
 0x2bf   : > { %1465 = vmatpush3.bf16.xpose.msra.mxu0 %v1044_v2  ;;  %1460 = vmatprep.mubr.msk.bf16.mxu1 %vm1644_vm1, %v1643_v17 }
 0x2c0   : > { %1466 = vmatprep.mubr.msk.bf16.mxu0 %vm1644_vm1, %v1643_v17  ;;  %1470 = vmatprep.subr.bf16.mxu1 %v1643_v17 }
 0x2c5   : > { %1461 = vmatmul.mubr.msk.bf16.vlgmr.msra.gmra.mxu1 %vm628_vm3, %v609_v4 }
 0x2c6   : > { %1467 = vmatmul.mubr.msk.bf16.vlgmr.msra.gmra.mxu0 %vm628_vm3, %v610_v5  ;;  %1474 = vmatprep.mubr.msk.bf16.mxu1 %vm1644_vm1, %v1643_v17 }
 0x2c7   : > { %1471 = vmatpush3.bf16.msra.mxu1 %v1546_v59 }
 0x2c8   : > { %1472 = vmatprep.subr.bf16.mxu1 %v1643_v17 }
 0x2cb   : > { %1473 = vmatpush3.bf16.msra.mxu1 %v1547_v61 }
 0x33d   : > { %v888_v6 = vpop.xlane.xlu0 %887 }
 0x33e   : > { %v891_v7 = vpop.xlane.xlu1 %890  ;;  %1556 = vrcp.f32 %v888_v6 }
 0x33f   : > { %1558 = vrcp.f32 %v891_v7 }
 0x341   : > { %v894_v8 = vpop.xlane.xlu0 %893 }
 0x342   : > { %1560 = vrcp.f32 %v894_v8 }
 0x345   : > { %v897_v10 = vpop.xlane.xlu0 %896 }
 0x346   : > { %1562 = vrcp.f32 %v897_v10 }
 0x34b   : > { %v1557_v14 = vpop.eup %1556 }
 0x34c   : > { %v1559_v15 = vpop.eup %1558  ;;  %v1099_v16 = vrot.slane %v1557_v14, %v1098_v13 }
 0x34d   : > { %v1103_v19 = vrot.slane %v1559_v15, %v1098_v13 }
 0x34f   : > { %v1561_v24 = vpop.eup %1560 }
 0x350   : > { %v1107_v31 = vrot.slane %v1561_v24, %v1098_v13 }
 0x353   : > { %v1563_v27 = vpop.eup %1562 }
 0x354   : > { %v1111_v33 = vrot.slane %v1563_v27, %v1098_v13 }
 0x37d   : > { %v942_v18 = vpop.f32.mrf.mxu1 }
 0x37e   : > { %v1146_v20 = vmul.f32 %v1099_v16, %v942_v18  ;;  %v988_v17 = vpop.f32.mrf.mxu0 }
 0x37f   : > { %v1147_v21 = vmul.f32 %v1103_v19, %v988_v17  ;;  %v1450_v22 = vpop.f32.mrf.mxu1 }
 0x380   : > { %v1456_v23 = vpop.f32.mrf.mxu0 }
 0x381   : > { %v1150_v25 = vpack.c.bf16 %v1147_v21, %v1146_v20  ;;  %v945_v26 = vpop.f32.mrf.mxu1 }
 0x382   : > { %v991_v28 = vpop.f32.mrf.mxu0 }
 0x383   : > { %1163 = vxpose.xlu1.c.b16.start [1/2] (short) (narrow) %v1150_v25, 16  ;;  %v1451_v29 = vpop.f32.mrf.mxu1 }
 0x384   : > { %v1457_v30 = vpop.f32.mrf.mxu0 }
 0x385   : > { %v1034_v32 = vpop.f32.mrf.mxu1 }
 0x386   : > { %v1148_v34 = vmul.f32 %v1107_v31, %v1034_v32  ;;  %v1080_v35 = vpop.f32.mrf.mxu0 }
 0x387   : > { %v1149_v36 = vmul.f32 %v1111_v33, %v1080_v35  ;;  %v1462_v37 = vpop.f32.mrf.mxu1 }
 0x388   : > { %v1468_v38 = vpop.f32.mrf.mxu0 }
 0x389   : > { %v1151_v39 = vpack.c.bf16 %v1149_v36, %v1148_v34  ;;  %v1037_v40 = vpop.f32.mrf.mxu1 }
 0x38a   : > { %v1083_v41 = vpop.f32.mrf.mxu0 }
 0x38b   : > { %1164 = vxpose.xlu1.c.b16.end [2/2] (short) (narrow) %v1151_v39, 16  ;;  %v1463_v42 = vpop.f32.mrf.mxu1 }
 0x38c   : > { %v1469_v43 = vpop.f32.mrf.mxu0 }
 0x3e9   : > { %v1171_v44 = vpop.trf.xlu1 }
 0x3ea   : > { %1475 = vmatmul.mubr.msk.bf16.vlgmr.msra.gmra.mxu1 %vm390_vm0, %v1171_v44 }
 0x4aa   : > { %v1228_v46 = vpop.f32.mrf.mxu1 }
 0x4ab   : > { %v1229_v47 = vadd.f32 %v1364_v45, %v1228_v46 }
 0x4ac   : > { %v1476_v48 = vpop.f32.mrf.mxu1 }
 0x4ad   : > { %1234 = vst.msk [vmem:[%s325_s23] sm:$0xff] %vm390_vm0, %v1229_v47 }
 0x4ae   : > { %v1231_v49 = vpop.f32.mrf.mxu1 }
 0x4af   : > { %1577 = shalt.err (!%p1574_p5)
}
 0x4b0   : > { %s1578_s21 = scalar_lea.hbm %s1893_s11, 128  ;;  %s1582_s23 = scalar_lea.hbm %s1948_s8, 256 }
 0x4b1   : > { %p1579_p6 = scmp.ne.s32.totalorder %s1893_s11, %s1578_s21  ;;  %p1583_p10 = scmp.lt.s32.totalorder %s1893_s11, %s1948_s8 }
 0x4b2   : > { %p1584_p11 = scmp.lt.s32.totalorder %s1582_s23, %s1578_s21 }
 0x4b3   : > { %p1580_p7 = pnand %p1579_p6, %p1731_p4 }
 0x4b4   : > { %p1585_p12 = por %p1584_p11, %p1583_p10 }
 0x4b5   : > { %p1581_p9 = pneg %p1580_p7 }
 0x4b7   : > { %p1586_p13 = pnand %p1585_p12, %p1581_p9 }
 0x4b9   : > { %1589 = shalt.err (!%p1586_p13)
}
 0x4ba   : > { %1478 = dma.vmem_to_hbm [thread:$0]  (%p1731_p4), %s1895_s25, 128, %s1893_s11, %s1236_s12   ;;  %v1477_v50 = vpop.f32.mrf.mxu1 }
 0x4bb PF: > { %p1484_p0 = scmp.ge.s32.totalorder %s1640_s10, 2  ;;  %s1262_s30 = sand.u32 1, %s1620_s27  }
 0x4bc   : > { %s1263_s14 = scalar_lea.sflag [#allocation3], %s1262_s30 }
 0x4bd   : > { %p1481_p1 = pnand %p1484_p0, %p1738_p8 }
 0x4bf   : > { %p1482_p2 = pneg %p1481_p1 }
 0x4c1   : > { %1615 = dma.done.wait (%p1482_p2), %s1263_s14, 128  }
 0x4c2   : > { %1617 = vsyncadd (%p1482_p2), %s1263_s14, 4294967168  ;;  %s21_s10 = sadd.s32 1, %s1640_s10   ;;  %s1951_s27 = smov %s1624_s28 }
 0x4c3   : > { %p18_p3 = scmp.ge.s32.totalorder %s21_s10, 4   ;;  %s1952_s28 = smov %s1628_s29 }
 0x4c4   : > { %s1953_s29 = smov %s1744_s18  ;;  %s1954_s30 = smov %s1636_s9 }
 0x4c5   : > { %s1955_s9 = smov %s1957_s13  ;;  %20 = sbr.rel (!%p18_p3) target bundleno = 4 (0x4), region = 90 }
 0x4ca   :  { %1268 = vsyncpa [#allocation3], 1 }
 0x4cb   :  { %1270 = vsyncpa [#allocation3 + $0x1], 1 }

</bundles_post_ra>
